<compile_context>
chip_gen: v7x
topology: tpu7x:2x2x1
jax: 0.10.0
libtpu: 0.0.40
codegen_flags: <defaults>
</compile_context>

<pallas_src>
import jax
import jax.numpy as jnp
from jax.experimental import pallas as pl
from jax.experimental.pallas import tpu as pltpu

LANES = 128
MAX_TILE_ROWS = 2048          # 1 MiB f32 data tile per stream

SMOOTH = 1.0
ALPHA = 0.25
GAMMA = 2.0


def _round_up(x, m):
    return ((x + m - 1) // m) * m


def _sublane_multiple(dtype):
    # f32 -> 8, bf16 -> 16, (u)int8/fp8 -> 32
    return max(8, 32 // jnp.dtype(dtype).itemsize)


def _megacore_config():
    """Return (leading-axis dimension semantics, number of row splits)."""
    kind = ""
    try:
        devs = jax.devices()
        if devs:
            kind = (getattr(devs[0], "device_kind", "") or "").lower()
    except Exception:
        pass
    if "v7" in kind or "tpu7" in kind:
        # 2 TensorCores per chip: shard the leading grid axis across cores.
        return getattr(pltpu, "CORE_PARALLEL", pltpu.PARALLEL), 2
    return pltpu.PARALLEL, 1


def dice_focal_loss(y_pred, y_true, *, binary_targets=False,
                    max_tile_rows=MAX_TILE_ROWS):
    """Pallas implementation of Dice_Focal.forward(y_pred, y_true)."""
    assert y_pred.shape == y_true.shape and y_pred.ndim == 4
    B, C, H, W = y_pred.shape
    n_total = B * C * H * W          # trace-time Python constant
    hw = H * W
    chw = C * H * W

    # ---- zero-copy flattening (reshape of contiguous NCHW is free) ----------
    p = y_pred.reshape(-1)
    t = y_true.reshape(-1)
    if n_total % LANES:
        # Ragged tail: fall back to one pad (single copy).  The padded elements
        # are flat-index >= n_total and get masked in-kernel.
        padded = _round_up(n_total, LANES)
        p = jnp.pad(p, (0, padded - n_total))
        t = jnp.pad(t, (0, padded - n_total))
        rows = padded // LANES
    else:
        rows = n_total // LANES
    p2d = p.reshape(rows, LANES)
    t2d = t.reshape(rows, LANES)

    # ---- tiling --------------------------------------------------------------
    mult = max(_sublane_multiple(p2d.dtype), _sublane_multiple(t2d.dtype))
    tile_rows = min(max_tile_rows, _round_up(rows, mult))
    if tile_rows > rows:
        tile_rows = rows              # single full-array block (always legal)
    tile_elems = tile_rows * LANES

    tiles_total = -(-rows // tile_rows)
    lead_sem, num_splits = _megacore_config()
    if tiles_total < num_splits:
        lead_sem, num_splits = pltpu.ARBITRARY, 1
    tiles_per_split = -(-tiles_total // num_splits)

    # int32 flat-index math inside the kernel (see review correctness note).
    assert num_splits * tiles_per_split * tile_elems < 2**31, (
        "tensor too large for int32 flat indexing")

    # Tiny per-row side array (rows x 1 int32, ~1/128 of the main streams):
    #   c0_start[r] = (first flat index of row r) mod (C*H*W)
    # computed in uint32 on the host so r*128 cannot overflow.
    rows_grid = tiles_total * tile_rows          # covers every (clamped) block
    row_start = jnp.arange(rows_grid, dtype=jnp.uint32) * jnp.uint32(LANES)
    c0_start = (row_start % jnp.uint32(chw)).astype(jnp.int32)
    c0_start = c0_start.reshape(rows_grid, 1)

    # number of conditional subtractions to reduce (c0_start + lane) mod chw
    n_wrap = 1 + (LANES - 2) // chw              # == 1 for any chw >= 127

    # ---- kernel --------------------------------------------------------------
    def kernel(p_ref, t_ref, c0s_ref, out_ref):
        i = pl.program_id(0)
        j = pl.program_id(1)

        @pl.when(j == 0)
        def _init():
            out_ref[...] = jnp.zeros_like(out_ref)

        base = (i * tiles_per_split + j) * tile_elems    # int32 scalar
        rem = n_total - base                             # in-bounds elements left

        pv = p_ref[...].astype(jnp.float32)
        tv = t_ref[...].astype(jnp.float32)
        lane = jax.lax.broadcasted_iota(jnp.int32, (tile_rows, LANES), 1)

        def accumulate(pvs, tvs):
            # channel-0 predicate from the per-row phase + lane iota (no div/rem)
            m = c0s_ref[...] + lane
            for _ in range(n_wrap):
                m = jnp.where(m >= chw, m - chw, m)
            c0 = m < hw

            inter_c = jnp.where(c0, pvs * tvs, 0.0)        # dice numerator
            pt_c = jnp.where(c0, pvs + tvs, 0.0)           # dice denominator

            if binary_targets:
                # single log per element -- only valid for {0,1} targets
                sel = jnp.where(tvs >= 0.5, pvs, 1.0 - pvs)
                bce = -jnp.maximum(jnp.log(sel), -100.0)
            else:
                # torch.binary_cross_entropy (log clamped at -100), rewritten as
                # t*(log1mp - logp) - log1mp to trim VALU ops.
                log_p = jnp.maximum(jnp.log(pvs), -100.0)
                log_1mp = jnp.maximum(jnp.log(1.0 - pvs), -100.0)
                bce = tvs * (log_1mp - log_p) - log_1mp

            # per-tile reduce-then-add into the small resident output block
            out_ref[0, 0:1, :] += jnp.sum(inter_c, axis=0, keepdims=True)
            out_ref[0, 1:2, :] += jnp.sum(pt_c, axis=0, keepdims=True)
            out_ref[0, 2:3, :] += jnp.sum(bce, axis=0, keepdims=True)

        @pl.when(rem >= tile_elems)
        def _full_tile():                    # hot path: no masking ops at all
            accumulate(pv, tv)

        @pl.when(jnp.logical_and(rem > 0, rem < tile_elems))
        def _edge_tile():                    # at most one per call
            row = jax.lax.broadcasted_iota(jnp.int32, (tile_rows, LANES), 0)
            valid = row * LANES + lane < rem
            # Zeroing both streams makes every invalid element contribute 0 to
            # all three sums (log(0) clamps to -100 and is multiplied by t=0),
            # and kills any NaN read from the padded part of the edge block.
            accumulate(jnp.where(valid, pv, 0.0), jnp.where(valid, tv, 0.0))
        # fully out-of-range duplicate tiles (rem <= 0) do nothing

    # ---- pallas_call ---------------------------------------------------------
    need_clamp = num_splits * tiles_per_split > tiles_total

    def blk_map(i, j):
        t_idx = i * tiles_per_split + j
        if need_clamp:
            t_idx = jnp.minimum(t_idx, tiles_total - 1)
        return (t_idx, 0)

    data_spec = pl.BlockSpec((tile_rows, LANES), blk_map)
    aux_spec = pl.BlockSpec((tile_rows, 1), blk_map)
    out_spec = pl.BlockSpec((1, 3, LANES), lambda i, j: (i, 0, 0))

    partials = pl.pallas_call(
        kernel,
        out_shape=jax.ShapeDtypeStruct((num_splits, 3, LANES), jnp.float32),
        grid_spec=pltpu.PrefetchScalarGridSpec(
            num_scalar_prefetch=0,
            grid=(num_splits, tiles_per_split),
            in_specs=[data_spec, data_spec, aux_spec],
            out_specs=out_spec,
        ),
        compiler_params=pltpu.CompilerParams(
            dimension_semantics=(lead_sem, pltpu.ARBITRARY),
            vmem_limit_bytes=32 * 1024 * 1024,
        ),
    )(p2d, t2d, c0_start)

    # ---- tiny scalar epilogue in JAX glue ------------------------------------
    sums = jnp.sum(partials, axis=(0, 2))        # (3,)
    inter, pt_sum, bce_sum = sums[0], sums[1], sums[2]

    dsc = (2.0 * inter + SMOOTH) / (pt_sum + SMOOTH)
    dice_loss = 1.0 - dsc

    bce_mean = bce_sum / float(n_total)
    focal_loss = ALPHA * (1.0 - jnp.exp(-bce_mean)) ** GAMMA * bce_mean
    return dice_loss + focal_loss


def _reference(y_pred, y_true):
    """Pure-JAX reference mirroring the PyTorch module."""
    p0 = y_pred[:, 0].reshape(-1)
    t0 = y_true[:, 0].reshape(-1)
    inter = jnp.sum(p0 * t0)
    dsc = (2.0 * inter + SMOOTH) / (jnp.sum(p0) + jnp.sum(t0) + SMOOTH)
    dice = 1.0 - dsc

    p = y_pred.reshape(-1)
    t = y_true.reshape(-1)
    bce = -(t * jnp.maximum(jnp.log(p), -100.0)
            + (1.0 - t) * jnp.maximum(jnp.log(1.0 - p), -100.0))
    bce_mean = jnp.mean(bce)
    focal = ALPHA * (1.0 - jnp.exp(-bce_mean)) ** GAMMA * bce_mean
    return dice + focal


if __name__ == "__main__":
    key = jax.random.PRNGKey(0)
    kp, kt = jax.random.split(key)

    B, C, H, W = 2, 4, 16, 16
    # Probabilities in (0, 1) for y_pred (BCE requires [0,1]); binary targets.
    y_pred = jax.random.uniform(kp, (B, C, H, W), jnp.float32,
                                minval=1e-4, maxval=1.0 - 1e-4)
    y_true = (jax.random.uniform(kt, (B, C, H, W), jnp.float32) > 0.5).astype(
        jnp.float32)

    ref = _reference(y_pred, y_true)

    # default (soft-target-safe) two-log BCE path
    loss = dice_focal_loss(y_pred, y_true)
    jax.block_until_ready(loss)
    assert jnp.allclose(loss, ref, rtol=1e-5, atol=1e-5), (loss, ref)

    # binary-target single-log fast path must match exactly for {0,1} targets
    loss_bin = dice_focal_loss(y_pred, y_true, binary_targets=True)
    jax.block_until_ready(loss_bin)
    assert jnp.allclose(loss_bin, ref, rtol=1e-5, atol=1e-5), (loss_bin, ref)

    print("KERNEL_OK")
</pallas_src>

<mosaic_0001>
module attributes {stable_mosaic.version = 11 : i64} {
  func.func @kernel(%arg0: i32, %arg1: i32, %arg2: memref<16x128xf32, #tpu.memory_space<vmem>>, %arg3: memref<16x128xf32, #tpu.memory_space<vmem>>, %arg4: memref<16x1xi32, #tpu.memory_space<vmem>>, %arg5: memref<1x3x128xf32, #tpu.memory_space<vmem>>) attributes {dimension_semantics = [#tpu.dimension_semantics<parallel>, #tpu.dimension_semantics<arbitrary>], iteration_bounds = array<i64: 1, 1>, scalar_prefetch = 0 : i64, scratch_operands = 0 : i64, tpu.core_type = #tpu.core_type<tc>, window_params = [{transform_indices = @transform_0, window_bounds = array<i64: 16, 128>}, {transform_indices = @transform_1, window_bounds = array<i64: 16, 128>}, {transform_indices = @transform_2, window_bounds = array<i64: 16, 1>}, {transform_indices = @transform_3, window_bounds = array<i64: 1, 3, 128>}]} {
    %c0_i32 = arith.constant 0 : i32
    %0 = arith.cmpi eq, %arg1, %c0_i32 : i32
    %1 = arith.extui %0 : i1 to i32
    %c0_i32_0 = arith.constant 0 : i32
    %2 = arith.cmpi ne, %1, %c0_i32_0 : i32
    scf.if %2 {
      %cst = arith.constant 0.000000e+00 : f32
      %18 = vector.broadcast %cst : f32 to vector<1x3x128xf32>
      %c0_10 = arith.constant 0 : index
      %c0_11 = arith.constant 0 : index
      %c0_12 = arith.constant 0 : index
      %19 = vector.load %arg5[%c0_10, %c0_11, %c0_12] : memref<1x3x128xf32, #tpu.memory_space<vmem>>, vector<1x3x128xf32>
      tpu.vector_store %arg5[%c0_10, %c0_11, %c0_12], %18 {strides = array<i32>} : memref<1x3x128xf32, #tpu.memory_space<vmem>>, vector<1x3x128xf32>,
    } else {
    }
    %c1_i32 = arith.constant 1 : i32
    %3 = arith.muli %arg0, %c1_i32 : i32
    %4 = arith.addi %3, %arg1 : i32
    %c2048_i32 = arith.constant 2048 : i32
    %5 = arith.muli %4, %c2048_i32 : i32
    %c2048_i32_1 = arith.constant 2048 : i32
    %6 = arith.subi %c2048_i32_1, %5 : i32
    %c0 = arith.constant 0 : index
    %c0_2 = arith.constant 0 : index
    %7 = vector.load %arg2[%c0, %c0_2] : memref<16x128xf32, #tpu.memory_space<vmem>>, vector<16x128xf32>
    %c0_3 = arith.constant 0 : index
    %c0_4 = arith.constant 0 : index
    %8 = vector.load %arg3[%c0_3, %c0_4] : memref<16x128xf32, #tpu.memory_space<vmem>>, vector<16x128xf32>
    %9 = tpu.iota {dimensions = array<i32: 1>} : vector<16x128xi32>
    %c2048_i32_5 = arith.constant 2048 : i32
    %10 = arith.cmpi sge, %6, %c2048_i32_5 : i32
    %11 = arith.extui %10 : i1 to i32
    %c0_i32_6 = arith.constant 0 : i32
    %12 = arith.cmpi ne, %11, %c0_i32_6 : i32
    scf.if %12 {
      %c0_10 = arith.constant 0 : index
      %c0_11 = arith.constant 0 : index
      %18 = vector.load %arg4[%c0_10, %c0_11] : memref<16x1xi32, #tpu.memory_space<vmem>>, vector<16x1xi32>
      %19 = vector.broadcast %18 : vector<16x1xi32> to vector<16x128xi32>
      %20 = arith.addi %19, %9 : vector<16x128xi32>
      %c1024_i32 = arith.constant 1024 : i32
      %21 = vector.broadcast %c1024_i32 : i32 to vector<16x128xi32>
      %22 = arith.cmpi sge, %20, %21 : vector<16x128xi32>
      %c1024_i32_12 = arith.constant 1024 : i32
      %23 = vector.broadcast %c1024_i32_12 : i32 to vector<16x128xi32>
      %24 = arith.subi %20, %23 : vector<16x128xi32>
      %25 = arith.select %22, %24, %20 : vector<16x128xi1>, vector<16x128xi32>
      %c256_i32 = arith.constant 256 : i32
      %26 = vector.broadcast %c256_i32 : i32 to vector<16x128xi32>
      %27 = arith.cmpi slt, %25, %26 : vector<16x128xi32>
      %28 = arith.mulf %7, %8 : vector<16x128xf32>
      %cst = arith.constant 0.000000e+00 : f32
      %29 = vector.broadcast %cst : f32 to vector<16x128xf32>
      %30 = arith.select %27, %28, %29 : vector<16x128xi1>, vector<16x128xf32>
      %31 = arith.addf %7, %8 : vector<16x128xf32>
      %cst_13 = arith.constant 0.000000e+00 : f32
      %32 = vector.broadcast %cst_13 : f32 to vector<16x128xf32>
      %33 = arith.select %27, %31, %32 : vector<16x128xi1>, vector<16x128xf32>
      %34 = math.log %7 : vector<16x128xf32>
      %cst_14 = arith.constant -1.000000e+02 : f32
      %35 = vector.broadcast %cst_14 : f32 to vector<16x128xf32>
      %36 = arith.maximumf %34, %35 : vector<16x128xf32>
      %cst_15 = arith.constant 1.000000e+00 : f32
      %37 = vector.broadcast %cst_15 : f32 to vector<16x128xf32>
      %38 = arith.subf %37, %7 : vector<16x128xf32>
      %39 = math.log %38 : vector<16x128xf32>
      %cst_16 = arith.constant -1.000000e+02 : f32
      %40 = vector.broadcast %cst_16 : f32 to vector<16x128xf32>
      %41 = arith.maximumf %39, %40 : vector<16x128xf32>
      %42 = arith.subf %41, %36 : vector<16x128xf32>
      %43 = arith.mulf %8, %42 : vector<16x128xf32>
      %44 = arith.subf %43, %41 : vector<16x128xf32>
      %c0_17 = arith.constant 0 : index
      %c0_18 = arith.constant 0 : index
      %c0_19 = arith.constant 0 : index
      %45 = vector.load %arg5[%c0_17, %c0_18, %c0_19] : memref<1x3x128xf32, #tpu.memory_space<vmem>>, vector<1x1x128xf32>
      %46 = vector.shape_cast %45 : vector<1x1x128xf32> to vector<1x128xf32>
      %cst_20 = arith.constant dense<0.000000e+00> : vector<128xf32>
      %47 = vector.multi_reduction <add>, %30, %cst_20 [0] : vector<16x128xf32> to vector<128xf32>
      %48 = vector.shape_cast %47 : vector<128xf32> to vector<1x128xf32>
      %49 = arith.addf %46, %48 : vector<1x128xf32>
      %c0_21 = arith.constant 0 : index
      %c0_22 = arith.constant 0 : index
      %c0_23 = arith.constant 0 : index
      %50 = vector.load %arg5[%c0_21, %c0_22, %c0_23] : memref<1x3x128xf32, #tpu.memory_space<vmem>>, vector<1x1x128xf32>
      %51 = vector.shape_cast %50 : vector<1x1x128xf32> to vector<1x128xf32>
      %52 = vector.shape_cast %49 : vector<1x128xf32> to vector<1x1x128xf32>
      tpu.vector_store %arg5[%c0_21, %c0_22, %c0_23], %52 {strides = array<i32>} : memref<1x3x128xf32, #tpu.memory_space<vmem>>, vector<1x1x128xf32>,
      %c0_24 = arith.constant 0 : index
      %c1 = arith.constant 1 : index
      %c0_25 = arith.constant 0 : index
      %53 = vector.load %arg5[%c0_24, %c1, %c0_25] : memref<1x3x128xf32, #tpu.memory_space<vmem>>, vector<1x1x128xf32>
      %54 = vector.shape_cast %53 : vector<1x1x128xf32> to vector<1x128xf32>
      %cst_26 = arith.constant dense<0.000000e+00> : vector<128xf32>
      %55 = vector.multi_reduction <add>, %33, %cst_26 [0] : vector<16x128xf32> to vector<128xf32>
      %56 = vector.shape_cast %55 : vector<128xf32> to vector<1x128xf32>
      %57 = arith.addf %54, %56 : vector<1x128xf32>
      %c0_27 = arith.constant 0 : index
      %c1_28 = arith.constant 1 : index
      %c0_29 = arith.constant 0 : index
      %58 = vector.load %arg5[%c0_27, %c1_28, %c0_29] : memref<1x3x128xf32, #tpu.memory_space<vmem>>, vector<1x1x128xf32>
      %59 = vector.shape_cast %58 : vector<1x1x128xf32> to vector<1x128xf32>
      %60 = vector.shape_cast %57 : vector<1x128xf32> to vector<1x1x128xf32>
      tpu.vector_store %arg5[%c0_27, %c1_28, %c0_29], %60 {strides = array<i32>} : memref<1x3x128xf32, #tpu.memory_space<vmem>>, vector<1x1x128xf32>,
      %c0_30 = arith.constant 0 : index
      %c2 = arith.constant 2 : index
      %c0_31 = arith.constant 0 : index
      %61 = vector.load %arg5[%c0_30, %c2, %c0_31] : memref<1x3x128xf32, #tpu.memory_space<vmem>>, vector<1x1x128xf32>
      %62 = vector.shape_cast %61 : vector<1x1x128xf32> to vector<1x128xf32>
      %cst_32 = arith.constant dense<0.000000e+00> : vector<128xf32>
      %63 = vector.multi_reduction <add>, %44, %cst_32 [0] : vector<16x128xf32> to vector<128xf32>
      %64 = vector.shape_cast %63 : vector<128xf32> to vector<1x128xf32>
      %65 = arith.addf %62, %64 : vector<1x128xf32>
      %c0_33 = arith.constant 0 : index
      %c2_34 = arith.constant 2 : index
      %c0_35 = arith.constant 0 : index
      %66 = vector.load %arg5[%c0_33, %c2_34, %c0_35] : memref<1x3x128xf32, #tpu.memory_space<vmem>>, vector<1x1x128xf32>
      %67 = vector.shape_cast %66 : vector<1x1x128xf32> to vector<1x128xf32>
      %68 = vector.shape_cast %65 : vector<1x128xf32> to vector<1x1x128xf32>
      tpu.vector_store %arg5[%c0_33, %c2_34, %c0_35], %68 {strides = array<i32>} : memref<1x3x128xf32, #tpu.memory_space<vmem>>, vector<1x1x128xf32>,
    } else {
    }
    %c0_i32_7 = arith.constant 0 : i32
    %13 = arith.cmpi sgt, %6, %c0_i32_7 : i32
    %c2048_i32_8 = arith.constant 2048 : i32
    %14 = arith.cmpi slt, %6, %c2048_i32_8 : i32
    %15 = arith.andi %13, %14 : i1
    %16 = arith.extui %15 : i1 to i32
    %c0_i32_9 = arith.constant 0 : i32
    %17 = arith.cmpi ne, %16, %c0_i32_9 : i32
    scf.if %17 {
      %18 = tpu.iota {dimensions = array<i32: 0>} : vector<16x128xi32>
      %c128_i32 = arith.constant 128 : i32
      %19 = vector.broadcast %c128_i32 : i32 to vector<16x128xi32>
      %20 = arith.muli %18, %19 : vector<16x128xi32>
      %21 = arith.addi %20, %9 : vector<16x128xi32>
      %22 = vector.broadcast %6 : i32 to vector<16x128xi32>
      %23 = arith.cmpi slt, %21, %22 : vector<16x128xi32>
      %cst = arith.constant 0.000000e+00 : f32
      %24 = vector.broadcast %cst : f32 to vector<16x128xf32>
      %25 = arith.select %23, %7, %24 : vector<16x128xi1>, vector<16x128xf32>
      %cst_10 = arith.constant 0.000000e+00 : f32
      %26 = vector.broadcast %cst_10 : f32 to vector<16x128xf32>
      %27 = arith.select %23, %8, %26 : vector<16x128xi1>, vector<16x128xf32>
      %c0_11 = arith.constant 0 : index
      %c0_12 = arith.constant 0 : index
      %28 = vector.load %arg4[%c0_11, %c0_12] : memref<16x1xi32, #tpu.memory_space<vmem>>, vector<16x1xi32>
      %29 = vector.broadcast %28 : vector<16x1xi32> to vector<16x128xi32>
      %30 = arith.addi %29, %9 : vector<16x128xi32>
      %c1024_i32 = arith.constant 1024 : i32
      %31 = vector.broadcast %c1024_i32 : i32 to vector<16x128xi32>
      %32 = arith.cmpi sge, %30, %31 : vector<16x128xi32>
      %c1024_i32_13 = arith.constant 1024 : i32
      %33 = vector.broadcast %c1024_i32_13 : i32 to vector<16x128xi32>
      %34 = arith.subi %30, %33 : vector<16x128xi32>
      %35 = arith.select %32, %34, %30 : vector<16x128xi1>, vector<16x128xi32>
      %c256_i32 = arith.constant 256 : i32
      %36 = vector.broadcast %c256_i32 : i32 to vector<16x128xi32>
      %37 = arith.cmpi slt, %35, %36 : vector<16x128xi32>
      %38 = arith.mulf %25, %27 : vector<16x128xf32>
      %cst_14 = arith.constant 0.000000e+00 : f32
      %39 = vector.broadcast %cst_14 : f32 to vector<16x128xf32>
      %40 = arith.select %37, %38, %39 : vector<16x128xi1>, vector<16x128xf32>
      %41 = arith.addf %25, %27 : vector<16x128xf32>
      %cst_15 = arith.constant 0.000000e+00 : f32
      %42 = vector.broadcast %cst_15 : f32 to vector<16x128xf32>
      %43 = arith.select %37, %41, %42 : vector<16x128xi1>, vector<16x128xf32>
      %44 = math.log %25 : vector<16x128xf32>
      %cst_16 = arith.constant -1.000000e+02 : f32
      %45 = vector.broadcast %cst_16 : f32 to vector<16x128xf32>
      %46 = arith.maximumf %44, %45 : vector<16x128xf32>
      %cst_17 = arith.constant 1.000000e+00 : f32
      %47 = vector.broadcast %cst_17 : f32 to vector<16x128xf32>
      %48 = arith.subf %47, %25 : vector<16x128xf32>
      %49 = math.log %48 : vector<16x128xf32>
      %cst_18 = arith.constant -1.000000e+02 : f32
      %50 = vector.broadcast %cst_18 : f32 to vector<16x128xf32>
      %51 = arith.maximumf %49, %50 : vector<16x128xf32>
      %52 = arith.subf %51, %46 : vector<16x128xf32>
      %53 = arith.mulf %27, %52 : vector<16x128xf32>
      %54 = arith.subf %53, %51 : vector<16x128xf32>
      %c0_19 = arith.constant 0 : index
      %c0_20 = arith.constant 0 : index
      %c0_21 = arith.constant 0 : index
      %55 = vector.load %arg5[%c0_19, %c0_20, %c0_21] : memref<1x3x128xf32, #tpu.memory_space<vmem>>, vector<1x1x128xf32>
      %56 = vector.shape_cast %55 : vector<1x1x128xf32> to vector<1x128xf32>
      %cst_22 = arith.constant dense<0.000000e+00> : vector<128xf32>
      %57 = vector.multi_reduction <add>, %40, %cst_22 [0] : vector<16x128xf32> to vector<128xf32>
      %58 = vector.shape_cast %57 : vector<128xf32> to vector<1x128xf32>
      %59 = arith.addf %56, %58 : vector<1x128xf32>
      %c0_23 = arith.constant 0 : index
      %c0_24 = arith.constant 0 : index
      %c0_25 = arith.constant 0 : index
      %60 = vector.load %arg5[%c0_23, %c0_24, %c0_25] : memref<1x3x128xf32, #tpu.memory_space<vmem>>, vector<1x1x128xf32>
      %61 = vector.shape_cast %60 : vector<1x1x128xf32> to vector<1x128xf32>
      %62 = vector.shape_cast %59 : vector<1x128xf32> to vector<1x1x128xf32>
      tpu.vector_store %arg5[%c0_23, %c0_24, %c0_25], %62 {strides = array<i32>} : memref<1x3x128xf32, #tpu.memory_space<vmem>>, vector<1x1x128xf32>,
      %c0_26 = arith.constant 0 : index
      %c1 = arith.constant 1 : index
      %c0_27 = arith.constant 0 : index
      %63 = vector.load %arg5[%c0_26, %c1, %c0_27] : memref<1x3x128xf32, #tpu.memory_space<vmem>>, vector<1x1x128xf32>
      %64 = vector.shape_cast %63 : vector<1x1x128xf32> to vector<1x128xf32>
      %cst_28 = arith.constant dense<0.000000e+00> : vector<128xf32>
      %65 = vector.multi_reduction <add>, %43, %cst_28 [0] : vector<16x128xf32> to vector<128xf32>
      %66 = vector.shape_cast %65 : vector<128xf32> to vector<1x128xf32>
      %67 = arith.addf %64, %66 : vector<1x128xf32>
      %c0_29 = arith.constant 0 : index
      %c1_30 = arith.constant 1 : index
      %c0_31 = arith.constant 0 : index
      %68 = vector.load %arg5[%c0_29, %c1_30, %c0_31] : memref<1x3x128xf32, #tpu.memory_space<vmem>>, vector<1x1x128xf32>
      %69 = vector.shape_cast %68 : vector<1x1x128xf32> to vector<1x128xf32>
      %70 = vector.shape_cast %67 : vector<1x128xf32> to vector<1x1x128xf32>
      tpu.vector_store %arg5[%c0_29, %c1_30, %c0_31], %70 {strides = array<i32>} : memref<1x3x128xf32, #tpu.memory_space<vmem>>, vector<1x1x128xf32>,
      %c0_32 = arith.constant 0 : index
      %c2 = arith.constant 2 : index
      %c0_33 = arith.constant 0 : index
      %71 = vector.load %arg5[%c0_32, %c2, %c0_33] : memref<1x3x128xf32, #tpu.memory_space<vmem>>, vector<1x1x128xf32>
      %72 = vector.shape_cast %71 : vector<1x1x128xf32> to vector<1x128xf32>
      %cst_34 = arith.constant dense<0.000000e+00> : vector<128xf32>
      %73 = vector.multi_reduction <add>, %54, %cst_34 [0] : vector<16x128xf32> to vector<128xf32>
      %74 = vector.shape_cast %73 : vector<128xf32> to vector<1x128xf32>
      %75 = arith.addf %72, %74 : vector<1x128xf32>
      %c0_35 = arith.constant 0 : index
      %c2_36 = arith.constant 2 : index
      %c0_37 = arith.constant 0 : index
      %76 = vector.load %arg5[%c0_35, %c2_36, %c0_37] : memref<1x3x128xf32, #tpu.memory_space<vmem>>, vector<1x1x128xf32>
      %77 = vector.shape_cast %76 : vector<1x1x128xf32> to vector<1x128xf32>
      %78 = vector.shape_cast %75 : vector<1x128xf32> to vector<1x1x128xf32>
      tpu.vector_store %arg5[%c0_35, %c2_36, %c0_37], %78 {strides = array<i32>} : memref<1x3x128xf32, #tpu.memory_space<vmem>>, vector<1x1x128xf32>,
    } else {
    }
    return
  }
  func.func @transform_0(%arg0: i32, %arg1: i32) -> (i32, i32) {
    %c1_i32 = arith.constant 1 : i32
    %0 = arith.muli %arg0, %c1_i32 : i32
    %1 = arith.addi %0, %arg1 : i32
    %c0_i32 = arith.constant 0 : i32
    %c0_i32_0 = arith.constant 0 : i32
    return %1, %c0_i32 : i32, i32
  }
  func.func @transform_1(%arg0: i32, %arg1: i32) -> (i32, i32) {
    %c1_i32 = arith.constant 1 : i32
    %0 = arith.muli %arg0, %c1_i32 : i32
    %1 = arith.addi %0, %arg1 : i32
    %c0_i32 = arith.constant 0 : i32
    %c0_i32_0 = arith.constant 0 : i32
    return %1, %c0_i32 : i32, i32
  }
  func.func @transform_2(%arg0: i32, %arg1: i32) -> (i32, i32) {
    %c1_i32 = arith.constant 1 : i32
    %0 = arith.muli %arg0, %c1_i32 : i32
    %1 = arith.addi %0, %arg1 : i32
    %c0_i32 = arith.constant 0 : i32
    %c0_i32_0 = arith.constant 0 : i32
    return %1, %c0_i32 : i32, i32
  }
  func.func @transform_3(%arg0: i32, %arg1: i32) -> (i32, i32, i32) {
    %c0_i32 = arith.constant 0 : i32
    %c0_i32_0 = arith.constant 0 : i32
    %c0_i32_1 = arith.constant 0 : i32
    return %arg0, %c0_i32, %c0_i32_0 : i32, i32, i32
  }
}

</mosaic_0001>

<bundles_post_ra>
// kernel: tpu_custom_call.1
= control target key start
LH: loop header
LB: loop body
LE: loop exit
PB: predicated region body
PF: predicated region fallthrough
CT: control target
= control target key end

     0   :  { %8 = vsyncpa [#allocation3], 0  ;;  %s327_s12 = smov [#allocation2]   ;;  %s397_s0 = inlined_call_operand.vmem [shape: f32[16,128], index: 0, kind: input, shape index: {}]   ;;  %s398_s1 = inlined_call_operand.hbm [shape: f32[16,128], index: 1, kind: input, shape index: {}]   ;;  %s399_s2 = inlined_call_operand.vmem [shape: s32[16,1], index: 2, kind: input, shape index: {}]   ;;  %s400_s3 = inlined_call_operand.vmem [shape: f32[1,3,128], index: 3, kind: output, shape index: {}]  }
   0x1   :  { %s28_s13 = sshll.u32 %s327_s12, 4  ;;  %s303_s16 = scalar_lea.hbm %s398_s1, 256  ;;  %s29_s13 = int_to_ptr.vmem [resolvable:$true] %s28_s13 }
   0x2   :  { %p304_p0 = scmp.ne.s32.totalorder %s398_s1, %s303_s16  ;;  %p307_p1 = scmp.lt.u32.totalorder %s303_s16, %s398_s1 }
   0x4   :  { %p309_p2 = pnand %p307_p1, %p304_p0 }
   0x6   :  { %312 = shalt.err (!%p309_p2)
}
   0x7   :  { %s313_s21 = scalar_lea.vmem %s29_s13, 256  ;;  %p318_p4 = scmp.lt.s32.totalorder %s29_s13, %s29_s13 }
   0x8   :  { %p314_p3 = scmp.ne.s32.totalorder %s29_s13, %s313_s21  ;;  %p319_p5 = scmp.lt.s32.totalorder %s313_s21, %s313_s21 }
   0xa   :  { %p320_p6 = por %p319_p5, %p318_p4 }
   0xc   :  { %p321_p7 = pnand %p320_p6, %p314_p3 }
   0xe   :  { %324 = shalt.err (!%p321_p7)
}
   0xf   :  { %s328_s22 = smov 128   ;;  %s329_s23 = smov 8  }
  0x10   :  { %34 = dma.hbm_to_vmem [thread:$0]  %s398_s1, 256, %s29_s13, [#allocation3], %s328_s22, %s328_s22, %s329_s23  }
  0x11   :  { %325 = dma.done.wait [#allocation3], 256  }
  0x12   :  { %326 = vsyncadd [#allocation3], 4294967040  ;;  %v330_v0 = vmov 0   ;;  %v96_v1 = vld [vmem:[%s399_s2] sm:$0xff]  ;;  %v87_v4 = vld [vmem:[%s397_s0 + $0x8] sm:$0xff]  ;;  %v331_v11 = vmov 0.0   ;;  %v90_v41 = vlaneseq }
  0x13   :  { %294 = vset.pattern.permute.xlu0 %v330_v0  ;;  %v86_v2 = vld [vmem:[%s397_s0] sm:$0xff]  ;;  %v97_v5 = vld [vmem:[%s399_s2 + $0x8] sm:$0xff]  ;;  %v129_v7 = vsub.f32 1.0, %v87_v4  ;;  %82 = vst [vmem:[%s400_s3] sm:$0x7] %v331_v11 }
  0x14   :  { %99 = vperm.xlu0 %294, %v96_v1   ;;  %295 = vlog2.f32 %v86_v2  ;;  %v128_v3 = vsub.f32 1.0, %v86_v2  ;;  %v88_v6 = vld [vmem:[#allocation2] sm:$0xff]  ;;  %v89_v10 = vld [vmem:[#allocation2 + $0x8] sm:$0xff]  ;;  %v91_v42 = vand.u32 127, %v90_v41 }
  0x15   :  { %297 = vlog2.f32 %v87_v4  ;;  %v114_v8 = vmul.f32 %v88_v6, %v86_v2  ;;  %v118_v9 = vadd.f32 %v88_v6, %v86_v2  ;;  %v115_v12 = vmul.f32 %v89_v10, %v87_v4 }
  0x16   :  { %299 = vlog2.f32 %v128_v3  ;;  %v119_v13 = vadd.f32 %v89_v10, %v87_v4 }
  0x17   :  { %301 = vlog2.f32 %v129_v7 }
  0x18   :  { %102 = vperm.xlu0 %294, %v97_v5  }
  0x1a   :  { %v162_v38 = vld [vmem:[%s400_s3 + $0x2] sm:$0x1]  ;;  %v142_v3 = vld [vmem:[%s400_s3] sm:$0x1]  ;;  %v152_v4 = vld [vmem:[%s400_s3 + $0x1] sm:$0x1] }
  0x1e   :  { %v296_v14 = vpop.eup %295 }
  0x1f   :  { %v298_v15 = vpop.eup %297  ;;  %v123_v16 = vmul.f32 0.6931472, %v296_v14 }
  0x20   :  { %v300_v17 = vpop.eup %299  ;;  %v125_v18 = vmul.f32 0.6931472, %v298_v15 }
  0x21   :  { %v302_v19 = vpop.eup %301  ;;  %v126_v20 = vmax.f32 %v123_v16, -100.0  ;;  %v131_v21 = vmul.f32 0.6931472, %v300_v17 }
  0x22   :  { %v127_v22 = vmax.f32 %v125_v18, -100.0  ;;  %v133_v23 = vmul.f32 0.6931472, %v302_v19 }
  0x23   :  { %v134_v24 = vmax.f32 %v131_v21, -100.0 }
  0x24   :  { %v135_v25 = vmax.f32 %v133_v23, -100.0 }
  0x25   :  { %v136_v26 = vsub.f32 %v134_v24, %v126_v20 }
  0x26   :  { %v137_v27 = vsub.f32 %v135_v25, %v127_v22 }
  0x27   :  { %v138_v28 = vmul.f32 %v136_v26, %v88_v6 }
  0x28   :  { %v139_v29 = vmul.f32 %v137_v27, %v89_v10 }
  0x29   :  { %v140_v30 = vsub.f32 %v138_v28, %v134_v24 }
  0x2a   :  { %v141_v31 = vsub.f32 %v139_v29, %v135_v25 }
  0x2c   :  { %v163_v32 = vadd.f32 %v141_v31, %v140_v30 }
  0x2e   :  { %v164_v33 = vrot.slane %v163_v32, 4 }
  0x30   :  { %v165_v34 = vadd.f32 %v164_v33, %v163_v32 }
  0x32   :  { %v166_v35 = vrot.slane %v165_v34, 2 }
  0x34   :  { %v167_v36 = vadd.f32 %v166_v35, %v165_v34 }
  0x36   :  { %v168_v37 = vrot.slane %v167_v36, 1 }
  0x38   :  { %v169_v39 = vadd.f32 %v168_v37, %v167_v36 }
  0x3a   :  { %v170_v40 = vadd.f32 %v169_v39, %v162_v38 }
  0x3c   :  { %171 = vst [vmem:[%s400_s3 + $0x2] sm:$0x1] %v170_v40 }
  0x93   :  { %v100_v43 = vpop.permute.xlu0 %99 }
  0x94   :  { %v104_v44 = vadd.s32 %v100_v43, %v91_v42 }
  0x96   :  { %vm106_vm0 = vcmp.ge.s32.totalorder %v104_v44, 1024  ;;  %v285_v45 = vadd.s32 4294966272, %v104_v44 }
  0x97   :  { %v103_v46 = vpop.permute.xlu0 %102 }
  0x98   :  { %v110_v47 = vsel %vm106_vm0, %v285_v45, %v104_v44  ;;  %v105_v48 = vadd.s32 %v103_v46, %v91_v42 }
  0x99   :  { %vm112_vm2 = vcmp.lt.s32.totalorder %v110_v47, 256 }
  0x9a   :  { %vm107_vm1 = vcmp.ge.s32.totalorder %v105_v48, 1024  ;;  %v286_v49 = vadd.s32 4294966272, %v105_v48  ;;  %v116_v51 = vsel %vm112_vm2, %v114_v8, 0.0  ;;  %v120_v52 = vsel %vm112_vm2, %v118_v9, 0.0 }
  0x9c   :  { %v111_v50 = vsel %vm107_vm1, %v286_v49, %v105_v48 }
  0x9d   :  { %vm113_vm3 = vcmp.lt.s32.totalorder %v111_v50, 256 }
  0x9e   :  { %v117_v53 = vsel %vm113_vm3, %v115_v12, 0.0  ;;  %v121_v54 = vsel %vm113_vm3, %v119_v13, 0.0 }
  0x9f   :  { %v143_v55 = vadd.f32 %v117_v53, %v116_v51  ;;  %v153_v56 = vadd.f32 %v121_v54, %v120_v52 }
  0xa1   :  { %v144_v57 = vrot.slane %v143_v55, 4  ;;  %v154_v58 = vrot.slane %v153_v56, 4 }
  0xa3   :  { %v145_v59 = vadd.f32 %v144_v57, %v143_v55  ;;  %v155_v60 = vadd.f32 %v154_v58, %v153_v56 }
  0xa5   :  { %v146_v61 = vrot.slane %v145_v59, 2  ;;  %v156_v62 = vrot.slane %v155_v60, 2 }
  0xa7   :  { %v147_v63 = vadd.f32 %v146_v61, %v145_v59  ;;  %v157_v0 = vadd.f32 %v156_v62, %v155_v60 }
  0xa9   :  { %v148_v1 = vrot.slane %v147_v63, 1  ;;  %v158_v2 = vrot.slane %v157_v0, 1 }
  0xab   :  { %v149_v5 = vadd.f32 %v148_v1, %v147_v63  ;;  %v159_v6 = vadd.f32 %v158_v2, %v157_v0 }
  0xad   :  { %v150_v7 = vadd.f32 %v149_v5, %v142_v3  ;;  %v160_v8 = vadd.f32 %v159_v6, %v152_v4 }
  0xaf   :  { %151 = vst [vmem:[%s400_s3] sm:$0x1] %v150_v7  ;;  %161 = vst [vmem:[%s400_s3 + $0x1] sm:$0x1] %v160_v8 }
  0xb0   :  { %272 = vsyncpa [#allocation3], 1 }

</bundles_post_ra>
